<compile_context>
chip_gen: v5e
topology: v5e:2x2
jax: 0.10.0
libtpu: 0.0.40
codegen_flags: <defaults>
</compile_context>

<pallas_src>
import functools
import math

import jax
import jax.numpy as jnp
from jax import lax
from jax.experimental import pallas as pl
from jax.experimental.pallas import tpu as pltpu

_MAX_TILE_LANES = 32768  # target lane-tile width per grid step


def _round_up(x, m):
    return -(-x // m) * m


def _make_loss_kernel(C, TN, SUB, n_valid):
    """Kernel for static channels C, lane tile TN, sub-chunk SUB, n_valid real pixels."""
    n_sub = TN // SUB
    needs_mask = (n_valid % TN) != 0  # only the last spatial tile can be ragged

    def kernel(logits_ref, target_ref, ce_ref, stats_ref, p_acc, poh_acc, ce_acc):
        n = pl.program_id(1)
        n_last = pl.num_programs(1) - 1

        # reset the per-batch accumulators at the first spatial tile
        @pl.when(n == 0)
        def _():
            p_acc[...] = jnp.zeros_like(p_acc)
            poh_acc[...] = jnp.zeros_like(poh_acc)
            ce_acc[...] = jnp.zeros_like(ce_acc)

        # class-id column; broadcast against the (1, SUB) target in the compare
        cls_col = lax.broadcasted_iota(jnp.int32, (C, 1), 0)

        def process(j, masked):
            start = pl.multiple_of(j * SUB, SUB)
            logits = logits_ref[:, pl.ds(start, SUB)].astype(jnp.float32)  # (C, SUB)
            tgt = target_ref[:, pl.ds(start, SUB)]                         # (1, SUB)

            if masked:
                col = lax.broadcasted_iota(jnp.int32, (1, SUB), 1) + (n * TN + start)
                valid = col < n_valid                                       # (1, SUB) bool
                # selection, not multiplication: garbage/NaN tail lanes must not propagate
                logits = jnp.where(valid, logits, 0.0)
                onehot = jnp.where(jnp.logical_and(cls_col == tgt, valid), 1.0, 0.0)
            else:
                onehot = jnp.where(cls_col == tgt, 1.0, 0.0)                # (C, SUB)

            # numerically-stable softmax over the channel (sublane) axis
            m = jnp.max(logits, axis=0, keepdims=True)                      # (1, SUB)
            e = jnp.exp(logits - m)                                         # (C, SUB)
            s = jnp.sum(e, axis=0, keepdims=True)                           # (1, SUB)
            p = e * pl.reciprocal(s, approx=True)                           # EUP vrcp

            # cross-entropy, algebraically folded: ce_pix = (m + log s) - logits[tgt]
            lse = m + jnp.log(s)
            tgt_logit = jnp.sum(onehot * logits, axis=0, keepdims=True)
            ce = lse - tgt_logit

            if masked:
                p_sum_term = jnp.where(valid, p, 0.0)
                ce = jnp.where(valid, ce, 0.0)
            else:
                p_sum_term = p

            p_acc[...] += p_sum_term
            poh_acc[...] += p * onehot      # onehot already carries the mask
            ce_acc[...] += ce

        def run_subchunks(masked):
            def body(j, carry):
                process(j, masked)
                return carry
            lax.fori_loop(0, n_sub, body, 0)

        if needs_mask:
            @pl.when(n != n_last)
            def _():
                run_subchunks(False)

            @pl.when(n == n_last)
            def _():
                run_subchunks(True)
        else:
            run_subchunks(False)

        # finalize once per batch element: cross-lane reduce + narrow stores
        @pl.when(n == n_last)
        def _():
            stats_ref[0] = jnp.sum(poh_acc[...], axis=1, keepdims=True)   # intersection
            stats_ref[1] = jnp.sum(p_acc[...], axis=1, keepdims=True)     # pred sum
            ce_ref[...] = jnp.sum(ce_acc[...], axis=1, keepdims=True)

    return kernel


@functools.partial(jax.jit, static_argnames=("weight_ce", "weight_dice", "smooth"))
def cluster_dice_ce_loss(net_output, target, weight_ce=1.0, weight_dice=1.0,
                         smooth=1e-5):
    """net_output: [B, C, *spatial] logits (any float dtype); target: [B, 1, *spatial] ints."""
    B, C = net_output.shape[0], net_output.shape[1]
    N = int(math.prod(net_output.shape[2:]))

    # native dtype straight into the kernel (bf16 stays bf16); no jnp.pad copies
    logits = net_output.reshape(B, C, N)
    tgt = target.reshape(B, 1, N).astype(jnp.int32)

    # sub-chunk width: keep C*SUB around 4K f32 elements (~4 vregs per temporary)
    SUB = max(128, min(2048, ((4096 // C) // 128) * 128))
    SUB = min(SUB, _round_up(N, 128))
    # lane tile: many sub-chunks per grid step, capped by a double-buffered VMEM
    # input budget that is safe on v5e (16 MiB scoped default) and v7x (64 MiB phys)
    itemsize = jnp.dtype(net_output.dtype).itemsize
    bytes_per_lane = C * itemsize + 4                     # logits + int32 target
    vmem_in_budget = 16 << 20
    tn_cap = max(SUB, (vmem_in_budget // (2 * bytes_per_lane)) // SUB * SUB)
    TN = min(_round_up(N, SUB), max(SUB, (_MAX_TILE_LANES // SUB) * SUB), tn_cap)
    grid_n = -(-N // TN)

    kernel = _make_loss_kernel(C, TN, SUB, N)

    # explicit scoped-VMEM budget: double-buffered inputs + accumulators + slack
    in_bytes = 2 * TN * bytes_per_lane
    scratch_bytes = (2 * C + 1) * SUB * 4
    vmem_limit = int(min(48 << 20, max(8 << 20, 2 * (in_bytes + scratch_bytes))))

    ce_sum, stats = pl.pallas_call(
        kernel,
        out_shape=(
            jax.ShapeDtypeStruct((B, 1, 1), jnp.float32),      # per-batch CE sum
            jax.ShapeDtypeStruct((B, 2, C, 1), jnp.float32),   # [intersection, pred-sum]
        ),
        grid_spec=pltpu.PrefetchScalarGridSpec(
            num_scalar_prefetch=0,
            grid=(B, grid_n),
            in_specs=[
                pl.BlockSpec((None, C, TN), lambda b, n: (b, 0, n)),
                pl.BlockSpec((None, 1, TN), lambda b, n: (b, 0, n)),
            ],
            out_specs=[
                pl.BlockSpec((None, 1, 1), lambda b, n: (b, 0, 0)),
                pl.BlockSpec((None, 2, C, 1), lambda b, n: (b, 0, 0, 0)),
            ],
            scratch_shapes=[
                pltpu.VMEM((C, SUB), jnp.float32),   # running sum of p
                pltpu.VMEM((C, SUB), jnp.float32),   # running sum of p * one-hot
                pltpu.VMEM((1, SUB), jnp.float32),   # running per-pixel CE
            ],
        ),
        compiler_params=pltpu.CompilerParams(
            dimension_semantics=("parallel", "arbitrary"),
            vmem_limit_bytes=vmem_limit),
    )(logits, tgt)

    # CE: mean over all (real) pixels (PyTorch CrossEntropyLoss default reduction)
    ce_loss = jnp.sum(ce_sum) / (B * N)

    # soft Dice per (batch, class), do_bg=False -> drop background class 0.
    inter = stats[:, 0, :, 0]                              # (B, C)
    psum = stats[:, 1, :, 0]                               # (B, C)
    # tsum is just the per-class label histogram: computed from the small int
    # target outside the kernel (drops a full-width accumulator in the kernel).
    labels = tgt[:, 0, :]                                  # (B, N)
    tsum = jnp.sum(
        (labels[:, :, None] == jnp.arange(C, dtype=jnp.int32)[None, None, :])
        .astype(jnp.float32), axis=1)                      # (B, C)
    dice = (2.0 * inter + smooth) / (psum + tsum + smooth)
    dc_loss = -jnp.mean(dice[:, 1:])

    return weight_ce * ce_loss + weight_dice * dc_loss


def _reference_loss(net_output, target, weight_ce=1.0, weight_dice=1.0, smooth=1e-5):
    """Pure-JAX reference of the same semantics (for sanity checking)."""
    B, C = net_output.shape[0], net_output.shape[1]
    logits = net_output.astype(jnp.float32)
    labels = target[:, 0].astype(jnp.int32)
    logp = jax.nn.log_softmax(logits, axis=1)
    ce = -jnp.mean(jnp.take_along_axis(logp, labels[:, None], axis=1))
    p = jax.nn.softmax(logits, axis=1)
    onehot = jax.nn.one_hot(labels, C, axis=1, dtype=jnp.float32)
    red_axes = tuple(range(2, net_output.ndim))
    inter = jnp.sum(p * onehot, axis=red_axes)
    denom = jnp.sum(p, axis=red_axes) + jnp.sum(onehot, axis=red_axes)
    dice = (2.0 * inter + smooth) / (denom + smooth)
    dc = -jnp.mean(dice[:, 1:])
    return weight_ce * ce + weight_dice * dc


if __name__ == "__main__":
    key = jax.random.PRNGKey(0)
    k1, k2, k3, k4, k5, k6 = jax.random.split(key, 6)

    # aligned case: H*W multiple of 128 -> single tile, single sub-chunk, no mask
    B, C, H, W = 2, 4, 16, 16
    net_output = jax.random.normal(k1, (B, C, H, W), dtype=jnp.float32)
    target = jax.random.randint(k2, (B, 1, H, W), 0, C, dtype=jnp.int32)
    loss = jax.block_until_ready(
        cluster_dice_ce_loss(net_output, target, weight_ce=1.0, weight_dice=1.0))
    ref = _reference_loss(net_output, target)
    assert jnp.allclose(loss, ref, rtol=1e-3, atol=1e-4), (loss, ref)

    # ragged case: H*W = 100 exercises the unpadded boundary block + where-mask path
    H2, W2 = 10, 10
    net_output2 = jax.random.normal(k3, (B, C, H2, W2), dtype=jnp.float32)
    target2 = jax.random.randint(k4, (B, 1, H2, W2), 0, C, dtype=jnp.int32)
    loss2 = jax.block_until_ready(cluster_dice_ce_loss(net_output2, target2))
    ref2 = _reference_loss(net_output2, target2)
    assert jnp.allclose(loss2, ref2, rtol=1e-3, atol=1e-4), (loss2, ref2)

    # mid-size case: H*W = 36864 exercises multi-tile grid, the in-kernel
    # sub-chunk loop, and a ragged last tile (36864 % 32768 != 0)
    H3, W3 = 192, 192
    net_output3 = jax.random.normal(k5, (B, C, H3, W3), dtype=jnp.float32)
    target3 = jax.random.randint(k6, (B, 1, H3, W3), 0, C, dtype=jnp.int32)
    loss3 = jax.block_until_ready(cluster_dice_ce_loss(net_output3, target3))
    ref3 = _reference_loss(net_output3, target3)
    assert jnp.allclose(loss3, ref3, rtol=1e-3, atol=1e-4), (loss3, ref3)

    print("KERNEL_OK")
</pallas_src>

<mosaic_0001>
module attributes {stable_mosaic.version = 11 : i64} {
  func.func @kernel(%arg0: i32, %arg1: i32, %arg2: memref<1x4x256xf32, #tpu.memory_space<vmem>>, %arg3: memref<1x1x256xi32, #tpu.memory_space<vmem>>, %arg4: memref<1x1x1xf32, #tpu.memory_space<vmem>>, %arg5: memref<1x2x4x1xf32, #tpu.memory_space<vmem>>, %arg6: memref<4x256xf32, #tpu.memory_space<vmem>>, %arg7: memref<4x256xf32, #tpu.memory_space<vmem>>, %arg8: memref<1x256xf32, #tpu.memory_space<vmem>>) attributes {dimension_semantics = [#tpu.dimension_semantics<parallel>, #tpu.dimension_semantics<arbitrary>], iteration_bounds = array<i64: 2, 1>, scalar_prefetch = 0 : i64, scratch_operands = 3 : i64, tpu.core_type = #tpu.core_type<tc>, window_params = [{transform_indices = @transform_0, window_bounds = array<i64: 1, 4, 256>}, {transform_indices = @transform_1, window_bounds = array<i64: 1, 1, 256>}, {transform_indices = @transform_2, window_bounds = array<i64: 1, 1, 1>}, {transform_indices = @transform_3, window_bounds = array<i64: 1, 2, 4, 1>}]} {
    %c0_i32 = arith.constant 0 : i32
    %0 = arith.cmpi eq, %arg1, %c0_i32 : i32
    %1 = arith.extui %0 : i1 to i32
    %c0_i32_0 = arith.constant 0 : i32
    %2 = arith.cmpi ne, %1, %c0_i32_0 : i32
    scf.if %2 {
      %cst_23 = arith.constant 0.000000e+00 : f32
      %47 = vector.broadcast %cst_23 : f32 to vector<4x256xf32>
      %c0_24 = arith.constant 0 : index
      %c0_25 = arith.constant 0 : index
      %48 = vector.load %arg6[%c0_24, %c0_25] : memref<4x256xf32, #tpu.memory_space<vmem>>, vector<4x256xf32>
      tpu.vector_store %arg6[%c0_24, %c0_25], %47 {strides = array<i32>} : memref<4x256xf32, #tpu.memory_space<vmem>>, vector<4x256xf32>,
      %cst_26 = arith.constant 0.000000e+00 : f32
      %49 = vector.broadcast %cst_26 : f32 to vector<4x256xf32>
      %c0_27 = arith.constant 0 : index
      %c0_28 = arith.constant 0 : index
      %50 = vector.load %arg7[%c0_27, %c0_28] : memref<4x256xf32, #tpu.memory_space<vmem>>, vector<4x256xf32>
      tpu.vector_store %arg7[%c0_27, %c0_28], %49 {strides = array<i32>} : memref<4x256xf32, #tpu.memory_space<vmem>>, vector<4x256xf32>,
      %cst_29 = arith.constant 0.000000e+00 : f32
      %51 = vector.broadcast %cst_29 : f32 to vector<1x256xf32>
      %c0_30 = arith.constant 0 : index
      %c0_31 = arith.constant 0 : index
      %52 = vector.load %arg8[%c0_30, %c0_31] : memref<1x256xf32, #tpu.memory_space<vmem>>, vector<1x256xf32>
      tpu.vector_store %arg8[%c0_30, %c0_31], %51 {strides = array<i32>} : memref<1x256xf32, #tpu.memory_space<vmem>>, vector<1x256xf32>,
    } else {
    }
    %3 = tpu.iota {dimensions = array<i32: 0>} : vector<4x1xi32>
    %c0_i32_1 = arith.constant 0 : i32
    %c256_i32 = arith.constant 256 : i32
    %4 = arith.muli %c0_i32_1, %c256_i32 : i32
    %5 = tpu.assume_multiple %4, 256 : i32
    %c0 = arith.constant 0 : index
    %c0_2 = arith.constant 0 : index
    %6 = arith.index_cast %5 : i32 to index
    %7 = vector.load %arg2[%c0, %c0_2, %6] : memref<1x4x256xf32, #tpu.memory_space<vmem>>, vector<1x4x256xf32>
    %8 = vector.shape_cast %7 : vector<1x4x256xf32> to vector<4x256xf32>
    %c0_3 = arith.constant 0 : index
    %c0_4 = arith.constant 0 : index
    %9 = arith.index_cast %5 : i32 to index
    %10 = vector.load %arg3[%c0_3, %c0_4, %9] : memref<1x1x256xi32, #tpu.memory_space<vmem>>, vector<1x1x256xi32>
    %11 = vector.shape_cast %10 : vector<1x1x256xi32> to vector<1x256xi32>
    %12 = vector.broadcast %3 : vector<4x1xi32> to vector<4x256xi32>
    %13 = vector.broadcast %11 : vector<1x256xi32> to vector<4x256xi32>
    %14 = arith.cmpi eq, %12, %13 : vector<4x256xi32>
    %cst = arith.constant 1.000000e+00 : f32
    %cst_5 = arith.constant 0.000000e+00 : f32
    %15 = vector.broadcast %cst : f32 to vector<4x256xf32>
    %16 = vector.broadcast %cst_5 : f32 to vector<4x256xf32>
    %17 = arith.select %14, %15, %16 : vector<4x256xi1>, vector<4x256xf32>
    %cst_6 = arith.constant dense<0xFF800000> : vector<256xf32>
    %18 = vector.multi_reduction <maximumf>, %8, %cst_6 [0] : vector<4x256xf32> to vector<256xf32>
    %19 = vector.shape_cast %18 : vector<256xf32> to vector<1x256xf32>
    %20 = vector.broadcast %19 : vector<1x256xf32> to vector<4x256xf32>
    %21 = arith.subf %8, %20 : vector<4x256xf32>
    %22 = math.exp %21 : vector<4x256xf32>
    %cst_7 = arith.constant dense<0.000000e+00> : vector<256xf32>
    %23 = vector.multi_reduction <add>, %22, %cst_7 [0] : vector<4x256xf32> to vector<256xf32>
    %24 = vector.shape_cast %23 : vector<256xf32> to vector<1x256xf32>
    %25 = tpu.reciprocal %24 {approx = true} : vector<1x256xf32> -> vector<1x256xf32>
    %26 = vector.broadcast %25 : vector<1x256xf32> to vector<4x256xf32>
    %27 = arith.mulf %22, %26 : vector<4x256xf32>
    %28 = math.log %24 : vector<1x256xf32>
    %29 = arith.addf %19, %28 : vector<1x256xf32>
    %30 = arith.mulf %17, %8 : vector<4x256xf32>
    %cst_8 = arith.constant dense<0.000000e+00> : vector<256xf32>
    %31 = vector.multi_reduction <add>, %30, %cst_8 [0] : vector<4x256xf32> to vector<256xf32>
    %32 = vector.shape_cast %31 : vector<256xf32> to vector<1x256xf32>
    %33 = arith.subf %29, %32 : vector<1x256xf32>
    %c0_9 = arith.constant 0 : index
    %c0_10 = arith.constant 0 : index
    %34 = vector.load %arg6[%c0_9, %c0_10] : memref<4x256xf32, #tpu.memory_space<vmem>>, vector<4x256xf32>
    %35 = arith.addf %34, %27 : vector<4x256xf32>
    %c0_11 = arith.constant 0 : index
    %c0_12 = arith.constant 0 : index
    %36 = vector.load %arg6[%c0_11, %c0_12] : memref<4x256xf32, #tpu.memory_space<vmem>>, vector<4x256xf32>
    tpu.vector_store %arg6[%c0_11, %c0_12], %35 {strides = array<i32>} : memref<4x256xf32, #tpu.memory_space<vmem>>, vector<4x256xf32>,
    %c0_13 = arith.constant 0 : index
    %c0_14 = arith.constant 0 : index
    %37 = vector.load %arg7[%c0_13, %c0_14] : memref<4x256xf32, #tpu.memory_space<vmem>>, vector<4x256xf32>
    %38 = arith.mulf %27, %17 : vector<4x256xf32>
    %39 = arith.addf %37, %38 : vector<4x256xf32>
    %c0_15 = arith.constant 0 : index
    %c0_16 = arith.constant 0 : index
    %40 = vector.load %arg7[%c0_15, %c0_16] : memref<4x256xf32, #tpu.memory_space<vmem>>, vector<4x256xf32>
    tpu.vector_store %arg7[%c0_15, %c0_16], %39 {strides = array<i32>} : memref<4x256xf32, #tpu.memory_space<vmem>>, vector<4x256xf32>,
    %c0_17 = arith.constant 0 : index
    %c0_18 = arith.constant 0 : index
    %41 = vector.load %arg8[%c0_17, %c0_18] : memref<1x256xf32, #tpu.memory_space<vmem>>, vector<1x256xf32>
    %42 = arith.addf %41, %33 : vector<1x256xf32>
    %c0_19 = arith.constant 0 : index
    %c0_20 = arith.constant 0 : index
    %43 = vector.load %arg8[%c0_19, %c0_20] : memref<1x256xf32, #tpu.memory_space<vmem>>, vector<1x256xf32>
    tpu.vector_store %arg8[%c0_19, %c0_20], %42 {strides = array<i32>} : memref<1x256xf32, #tpu.memory_space<vmem>>, vector<1x256xf32>,
    %c1_i32 = arith.constant 1 : i32
    %c0_i32_21 = arith.constant 0 : i32
    %44 = arith.cmpi eq, %arg1, %c0_i32_21 : i32
    %45 = arith.extui %44 : i1 to i32
    %c0_i32_22 = arith.constant 0 : i32
    %46 = arith.cmpi ne, %45, %c0_i32_22 : i32
    scf.if %46 {
      %c0_23 = arith.constant 0 : index
      %c0_24 = arith.constant 0 : index
      %47 = vector.load %arg7[%c0_23, %c0_24] : memref<4x256xf32, #tpu.memory_space<vmem>>, vector<4x256xf32>
      %cst_25 = arith.constant dense<0.000000e+00> : vector<4xf32>
      %48 = vector.multi_reduction <add>, %47, %cst_25 [1] : vector<4x256xf32> to vector<4xf32>
      %49 = vector.shape_cast %48 : vector<4xf32> to vector<4x1xf32>
      %c0_26 = arith.constant 0 : index
      %c0_27 = arith.constant 0 : index
      %c0_28 = arith.constant 0 : index
      %c0_29 = arith.constant 0 : index
      %50 = vector.load %arg5[%c0_26, %c0_27, %c0_28, %c0_29] : memref<1x2x4x1xf32, #tpu.memory_space<vmem>>, vector<1x1x4x1xf32>
      %51 = vector.shape_cast %50 : vector<1x1x4x1xf32> to vector<4x1xf32>
      %52 = vector.shape_cast %49 : vector<4x1xf32> to vector<1x1x4x1xf32>
      tpu.vector_store %arg5[%c0_26, %c0_27, %c0_28, %c0_29], %52 {strides = array<i32>} : memref<1x2x4x1xf32, #tpu.memory_space<vmem>>, vector<1x1x4x1xf32>,
      %c0_30 = arith.constant 0 : index
      %c0_31 = arith.constant 0 : index
      %53 = vector.load %arg6[%c0_30, %c0_31] : memref<4x256xf32, #tpu.memory_space<vmem>>, vector<4x256xf32>
      %cst_32 = arith.constant dense<0.000000e+00> : vector<4xf32>
      %54 = vector.multi_reduction <add>, %53, %cst_32 [1] : vector<4x256xf32> to vector<4xf32>
      %55 = vector.shape_cast %54 : vector<4xf32> to vector<4x1xf32>
      %c0_33 = arith.constant 0 : index
      %c1 = arith.constant 1 : index
      %c0_34 = arith.constant 0 : index
      %c0_35 = arith.constant 0 : index
      %56 = vector.load %arg5[%c0_33, %c1, %c0_34, %c0_35] : memref<1x2x4x1xf32, #tpu.memory_space<vmem>>, vector<1x1x4x1xf32>
      %57 = vector.shape_cast %56 : vector<1x1x4x1xf32> to vector<4x1xf32>
      %58 = vector.shape_cast %55 : vector<4x1xf32> to vector<1x1x4x1xf32>
      tpu.vector_store %arg5[%c0_33, %c1, %c0_34, %c0_35], %58 {strides = array<i32>} : memref<1x2x4x1xf32, #tpu.memory_space<vmem>>, vector<1x1x4x1xf32>,
      %c0_36 = arith.constant 0 : index
      %c0_37 = arith.constant 0 : index
      %59 = vector.load %arg8[%c0_36, %c0_37] : memref<1x256xf32, #tpu.memory_space<vmem>>, vector<1x256xf32>
      %cst_38 = arith.constant dense<0.000000e+00> : vector<1xf32>
      %60 = vector.multi_reduction <add>, %59, %cst_38 [1] : vector<1x256xf32> to vector<1xf32>
      %61 = vector.shape_cast %60 : vector<1xf32> to vector<1x1xf32>
      %c0_39 = arith.constant 0 : index
      %c0_40 = arith.constant 0 : index
      %c0_41 = arith.constant 0 : index
      %62 = vector.load %arg4[%c0_39, %c0_40, %c0_41] : memref<1x1x1xf32, #tpu.memory_space<vmem>>, vector<1x1x1xf32>
      %63 = vector.shape_cast %62 : vector<1x1x1xf32> to vector<1x1xf32>
      %64 = vector.shape_cast %61 : vector<1x1xf32> to vector<1x1x1xf32>
      tpu.vector_store %arg4[%c0_39, %c0_40, %c0_41], %64 {strides = array<i32>} : memref<1x1x1xf32, #tpu.memory_space<vmem>>, vector<1x1x1xf32>,
    } else {
    }
    return
  }
  func.func @transform_0(%arg0: i32, %arg1: i32) -> (i32, i32, i32) {
    %c0_i32 = arith.constant 0 : i32
    %c0_i32_0 = arith.constant 0 : i32
    return %arg0, %c0_i32, %arg1 : i32, i32, i32
  }
  func.func @transform_1(%arg0: i32, %arg1: i32) -> (i32, i32, i32) {
    %c0_i32 = arith.constant 0 : i32
    %c0_i32_0 = arith.constant 0 : i32
    return %arg0, %c0_i32, %arg1 : i32, i32, i32
  }
  func.func @transform_2(%arg0: i32, %arg1: i32) -> (i32, i32, i32) {
    %c0_i32 = arith.constant 0 : i32
    %c0_i32_0 = arith.constant 0 : i32
    %c0_i32_1 = arith.constant 0 : i32
    return %arg0, %c0_i32, %c0_i32_0 : i32, i32, i32
  }
  func.func @transform_3(%arg0: i32, %arg1: i32) -> (i32, i32, i32, i32) {
    %c0_i32 = arith.constant 0 : i32
    %c0_i32_0 = arith.constant 0 : i32
    %c0_i32_1 = arith.constant 0 : i32
    %c0_i32_2 = arith.constant 0 : i32
    return %arg0, %c0_i32, %c0_i32_0, %c0_i32_1 : i32, i32, i32, i32
  }
}

</mosaic_0001>

<bundles_post_ra>
// kernel: eq.8
= control target key start
LH: loop header
LB: loop body
LE: loop exit
PB: predicated region body
PF: predicated region fallthrough
CT: control target
= control target key end

     0   :  { %s8_s6 = smov 3  ;;  %s11_s7 = smov 12  ;;  %vm13_vm0 = vcmask 1043458   ;;  %vm3_vm1 = vcmask 130048   ;;  %vm17_vm2 = vcmask 1048448   ;;  %vm31_vm3 = vcmask 917248   ;;  %s214_s0 = inlined_call_operand.vmem [shape: s32[2,1,16,16], index: 0, kind: input, shape index: {}]   ;;  %s215_s1 = inlined_call_operand.vmem [shape: s32[2,256], index: 1, kind: output, shape index: {}]  }
   0x1   :  { %v117_v0 = vld [vmem:[%s214_s0 + $0x7] ss:$16 sm:%s8_s6]   ;;  %v118_v1 = vld [vmem:[%s214_s0 - $0x11] ss:$16 sm:%s11_s7]   ;;  %s36_s12 = smov 3  ;;  %s39_s15 = smov 12 }
   0x2   :  { %v14_v2 = vsel %vm13_vm0, %v118_v1, %v117_v0  ;;  %v121_v3 = vld [vmem:[%s214_s0 + $0x5] ss:$16 sm:%s36_s12]   ;;  %s139_s16 = smov 112   ;;  %v122_v4 = vld [vmem:[%s214_s0 - $0x13] ss:$16 sm:%s39_s15]   ;;  %s22_s19 = smov 3 }
   0x3   :  { %15 = vrot.lane.b32.xlu0 %v14_v2, %s139_s16  ;;  %s25_s20 = smov 12  ;;  %v42_v5 = vsel %vm13_vm0, %v122_v4, %v121_v3  ;;  %v119_v6 = vld [vmem:[%s214_s0 + $0x6] ss:$16 sm:%s22_s19]   ;;  %s50_s23 = smov 3  ;;  %vm45_vm4 = vcmask 786048   ;;  %vm59_vm5 = vcmask 654848  }
   0x4   :  { %s140_s24 = smov 80   ;;  %v120_v7 = vld [vmem:[%s214_s0 - $0x12] ss:$16 sm:%s25_s20]   ;;  %s53_s27 = smov 12  ;;  %v123_v8 = vld [vmem:[%s214_s0 + $0x4] ss:$16 sm:%s50_s23]  }
   0x5   :  { %43 = vrot.lane.b32.xlu1 %v42_v5, %s140_s24  ;;  %v124_v9 = vld [vmem:[%s214_s0 - $0x14] ss:$16 sm:%s53_s27]   ;;  %s92_s3 = smov 3  ;;  %s64_s4 = smov 3  ;;  %v28_v10 = vsel %vm13_vm0, %v120_v7, %v119_v6  ;;  %vm73_vm6 = vcmask 523648   ;;  %vm87_vm7 = vcmask 392448  }
   0x6   :  { %v125_v11 = vld [vmem:[%s214_s0 + $0x3] ss:$16 sm:%s64_s4]   ;;  %s67_s7 = smov 12  ;;  %s95_s8 = smov 12  ;;  %v56_v13 = vsel %vm13_vm0, %v124_v9, %v123_v8  ;;  %v129_v15 = vld [vmem:[%s214_s0 + $0x1] ss:$16 sm:%s92_s3]  }
   0x7   :  { %v126_v12 = vld [vmem:[%s214_s0 - $0x15] ss:$16 sm:%s67_s7]   ;;  %s78_s11 = smov 3  ;;  %s81_s12 = smov 12  ;;  %v130_v16 = vld [vmem:[%s214_s0 - $0x17] ss:$16 sm:%s95_s8]  }
   0x8   :  { %v70_v14 = vsel %vm13_vm0, %v126_v12, %v125_v11  ;;  %s141_s13 = smov 96   ;;  %s142_s16 = smov 48   ;;  %v127_v17 = vld [vmem:[%s214_s0 + $0x2] ss:$16 sm:%s78_s11]   ;;  %v128_v18 = vld [vmem:[%s214_s0 - $0x16] ss:$16 sm:%s81_s12]   ;;  %v98_v19 = vsel %vm13_vm0, %v130_v16, %v129_v15 }
   0x9   :  { %71 = vrot.lane.b32.xlu2 %v70_v14, %s142_s16  ;;  %s143_s21 = smov 64   ;;  %v84_v20 = vsel %vm13_vm0, %v128_v18, %v127_v17  ;;  %s144_s24 = smov 16   ;;  %v2_v21 = vld [vmem:[%s214_s0] ss:$8 sm:$0xf]   ;;  %vm101_vm8 = vcmask 261248  }
   0xa   :  { %s145_s25 = smov 32   ;;  %4 = vst.msk [vmem:[#allocation0] ss:$8 sm:$0x3] %vm3_vm1, %v2_v21  }
   0xb   :  { %29 = vrot.lane.b32.xlu0 %v28_v10, %s141_s13  ;;  %6 = vst.msk [vmem:[#allocation0 - $0xf] ss:$8 sm:$0xc] %vm3_vm1, %v2_v21  }
   0xd   :  { %57 = vrot.lane.b32.xlu1 %v56_v13, %s143_s21 }
  0x11   :  { %85 = vrot.lane.b32.xlu2 %v84_v20, %s145_s25 }
  0x13   :  { %99 = vrot.lane.b32.xlu0 %v98_v19, %s144_s24 }
  0x63   :  { %v72_v22 = vpop.permute.xlu2 %71  }
  0x6b   :  { %v86_v23 = vpop.permute.xlu2 %85  }
  0x75   :  { %v16_v24 = vpop.permute.xlu0 %15  }
  0x76   :  { %18 = vst.msk [vmem:[#allocation0] sm:$0x3] %vm17_vm2, %v16_v24  }
  0x77   :  { %20 = vst.msk [vmem:[#allocation0 + $0x6] sm:$0xc] %vm17_vm2, %v16_v24   ;;  %v44_v25 = vpop.permute.xlu1 %43  }
  0x7d   :  { %v30_v26 = vpop.permute.xlu0 %29  }
  0x7e   :  { %32 = vst.msk [vmem:[#allocation0] sm:$0x3] %vm31_vm3, %v30_v26  }
  0x7f   :  { %34 = vst.msk [vmem:[#allocation0 + $0x6] sm:$0xc] %vm31_vm3, %v30_v26   ;;  %v58_v27 = vpop.permute.xlu1 %57  }
  0x80   :  { %46 = vst.msk [vmem:[#allocation0] sm:$0x3] %vm45_vm4, %v44_v25  }
  0x81   :  { %48 = vst.msk [vmem:[#allocation0 + $0x6] sm:$0xc] %vm45_vm4, %v44_v25  }
  0x82   :  { %60 = vst.msk [vmem:[#allocation0] sm:$0x3] %vm59_vm5, %v58_v27  }
  0x83   :  { %62 = vst.msk [vmem:[#allocation0 + $0x6] sm:$0xc] %vm59_vm5, %v58_v27  }
  0x84   :  { %74 = vst.msk [vmem:[#allocation0] sm:$0x3] %vm73_vm6, %v72_v22  }
  0x85   :  { %76 = vst.msk [vmem:[#allocation0 + $0x6] sm:$0xc] %vm73_vm6, %v72_v22   ;;  %v100_v28 = vpop.permute.xlu0 %99  }
  0x86   :  { %88 = vst.msk [vmem:[#allocation0] sm:$0x3] %vm87_vm7, %v86_v23  }
  0x87   :  { %90 = vst.msk [vmem:[#allocation0 + $0x6] sm:$0xc] %vm87_vm7, %v86_v23  }
  0x88   :  { %102 = vst.msk [vmem:[#allocation0] sm:$0x3] %vm101_vm8, %v100_v28  }
  0x89   :  { %104 = vst.msk [vmem:[#allocation0 + $0x6] sm:$0xc] %vm101_vm8, %v100_v28  }
  0x8f   :  { %v107_v29 = vld [vmem:[#allocation0] sm:$0x3] }
  0x90   :  { %110 = vst [vmem:[%s215_s1] sm:$0x3] %v107_v29  ;;  %v112_v30 = vld [vmem:[#allocation0 + $0x8] sm:$0x3] }
  0x91   :  { %131 = vst [vmem:[%s215_s1 + $0x2] sm:$0x3] %v112_v30 }

// kernel: cluster_dice_ce_loss.1
= control target key start
LH: loop header
LB: loop body
LE: loop exit
PB: predicated region body
PF: predicated region fallthrough
CT: control target
= control target key end

     0   :  { %s621_s12 = smov 0   ;;  %s623_s13 = smov 0   ;;  %s705_s0 = inlined_call_operand.vmem [shape: f32[2,4,256], index: 0, kind: input, shape index: {}]   ;;  %s706_s1 = inlined_call_operand.vmem [shape: s32[2,1,256], index: 1, kind: input, shape index: {}]   ;;  %s707_s2 = inlined_call_operand.vmem [shape: f32[2,1,1], index: 2, kind: output, shape index: {0}]   ;;  %s708_s3 = inlined_call_operand.vmem [shape: f32[2,2,4,1], index: 3, kind: output, shape index: {1}]  }
   0x1   :  { %s625_s14 = smov 0  }
   0x2 LB: > { %s26_s15 = sadd.s32 1, %s594_s13  ;;  %p530_p0 = scmp.ge.s32.totalorder %s598_s14, 1  ;;  %s598_s14 = sphi %s625_s14, %s14_s14   ;;  %s594_s13 = sphi %s623_s13, %s712_s13   ;;  %s590_s12 = sphi %s621_s12, %s711_s12  }
   0x3   : > { %p28_p1 = scmp.ge.s32.totalorder %s26_s15, 2  ;;  %p175_p2 = scmp.lt.s32.totalorder %s598_s14, 3 }
   0x5   : > { %s714_s15 = smov (%p28_p1, %s26_s15), 0  ;;  %p176_p3 = pnand %p530_p0, %p175_p2 }
   0x6   : > { %p215_p4 = scmp.lt.s32.totalorder (!%p176_p3), %s590_s12, 1 }
   0x7   : > { %179 = sbr.rel (%p176_p3) target bundleno = 224 (0xe0), region = 28 }
   0xc   : > { %s716_s12 = smov (!%p215_p4, %s590_s12), 1  ;;  %vm268_vm0 = vcmask 1043456   ;;  %v247_v21 = vlaneseq  ;;  %v600_v24 = vmov 0.0   ;;  %vm364_vm4 = vcmask 1040384  }
   0xd   : > { %s539_s16 = sshll.u32 %s716_s12, 3  ;;  %s533_s20 = sshll.u32 %s716_s12, 1  ;;  %vm388_vm5 = vcmask 3072   ;;  %vm415_vm6 = vcmask 0  }
   0xe   : > { %s222_s19 = scalar_lea.vmem %s705_s0, %s539_s16  ;;  %vm659_vm1 = vcmp.lt.s32.totalorder %v247_v21, 256  ;;  %s231_s23 = scalar_lea.vmem %s706_s1, %s533_s20  ;;  %v253_v26 = vshrl.u32 %v247_v21, 7 }
   0xf   : > { %v254_v0 = vld [vmem:[%s222_s19] sm:$0xff]  ;;  %251 = vst.msk [vmem:[#allocation4] sm:$0x3] %vm659_vm1, %v600_v24  ;;  %s240_s26 = scalar_lea.vmem %s708_s3, %s539_s16  ;;  %s235_s29 = scalar_lea.vmem %s707_s2, %s716_s12 }
  0x10   : > { %263 = vst [vmem:[#allocation1] ss:$2 sm:$0xff] %v254_v0  ;;  %v255_v25 = vld [vmem:[%s231_s23] sm:$0x3] }
  0x11   : > { %v256_v27 = vperm.slane %v255_v25, 0  ;;  %v257_v28 = vperm.slane %v255_v25, 1 }
  0x13   : > { %vm258_vm2 = vcmp.eq.s32.totalorder %v253_v26, %v256_v27  ;;  %vm259_vm3 = vcmp.eq.s32.totalorder %v253_v26, %v257_v28 }
  0x14   : > { %v260_v37 = vsel %vm258_vm2, 1.0, %v600_v24  ;;  %v261_v38 = vsel %vm259_vm3, 1.0, %v600_v24 }
  0x15   : > { %v354_v61 = vrot.slane %v261_v38, 4 }
  0x17   : > { %v264_v1 = vld.sshfl [vmem:[#allocation1] sm:$0xff pattern:$0x75316420]  ;;  %v265_v2 = vld.sshfl [vmem:[#allocation1 + $0x8] sm:$0xff pattern:$0x75316420] }
  0x18   : > { %v269_v3 = vsel %vm268_vm0, %v264_v1, -inf  ;;  %v276_v4 = vsel %vm268_vm0, %v265_v2, -inf }
  0x19   : > { %v270_v5 = vrot.slane %v269_v3, 4  ;;  %v277_v6 = vrot.slane %v276_v4, 4 }
  0x1b   : > { %v271_v7 = vmax.f32 %v269_v3, %v270_v5  ;;  %v278_v8 = vmax.f32 %v276_v4, %v277_v6  ;;  %v355_v5 = vsel %vm268_vm0, %v260_v37, %v354_v61 }
  0x1d   : > { %v272_v9 = vrot.slane %v271_v7, 2  ;;  %v279_v10 = vrot.slane %v278_v8, 2 }
  0x1f   : > { %v273_v11 = vmax.f32 %v271_v7, %v272_v9  ;;  %v280_v12 = vmax.f32 %v278_v8, %v279_v10 }
  0x21   : > { %v274_v13 = vrot.slane %v273_v11, 1  ;;  %v281_v14 = vrot.slane %v280_v12, 1 }
  0x23   : > { %v649_v15 = vmax.f32 %v273_v11, %v274_v13  ;;  %v651_v16 = vmax.f32 %v280_v12, %v281_v14 }
  0x25   : > { %v285_v17 = vrot.slane %v651_v16, 4 }
  0x27   : > { %v286_v18 = vsel %vm268_vm0, %v649_v15, %v285_v17 }
  0x28   : > { %v288_v19 = vsub.f32 %v254_v0, %v286_v18 }
  0x2a   : > { %v289_v20 = vmul.f32 1.442695, %v288_v19  ;;  %v360_v19 = vld [vmem:[#allocation4] sm:$0x3] }
  0x2c   : > { %566 = vpow2.f32 %v289_v20 }
  0x32   : > { %v657_v22 = vpop.eup %566 }
  0x33   : > { %292 = vst [vmem:[#allocation1] ss:$2 sm:$0xff] %v657_v22 }
  0x3a   : > { %v293_v29 = vld.sshfl [vmem:[#allocation1] sm:$0xff pattern:$0x75316420]  ;;  %v294_v30 = vld.sshfl [vmem:[#allocation1 + $0x8] sm:$0xff pattern:$0x75316420] }
  0x3b   : > { %v297_v31 = vsel %vm268_vm0, %v293_v29, 0.0  ;;  %v304_v32 = vsel %vm268_vm0, %v294_v30, 0.0  ;;  %325 = vst [vmem:[#allocation1] ss:$2 sm:$0xff] %v254_v0 }
  0x3c   : > { %v298_v33 = vrot.slane %v297_v31, 4  ;;  %v305_v34 = vrot.slane %v304_v32, 4 }
  0x3e   : > { %v299_v35 = vadd.f32 %v298_v33, %v297_v31  ;;  %v306_v36 = vadd.f32 %v305_v34, %v304_v32 }
  0x40   : > { %v300_v39 = vrot.slane %v299_v35, 2  ;;  %v307_v40 = vrot.slane %v306_v36, 2 }
  0x42   : > { %v301_v41 = vadd.f32 %v300_v39, %v299_v35  ;;  %v308_v42 = vadd.f32 %v307_v40, %v306_v36  ;;  %v326_v43 = vld.sshfl [vmem:[#allocation1] sm:$0xff pattern:$0x75316420]  ;;  %v327_v44 = vld.sshfl [vmem:[#allocation1 + $0x8] sm:$0xff pattern:$0x75316420] }
  0x43   : > { %v330_v45 = vmul.f32 %v326_v43, %v260_v37  ;;  %v331_v46 = vmul.f32 %v327_v44, %v261_v38 }
  0x44   : > { %v302_v47 = vrot.slane %v301_v41, 1  ;;  %v309_v48 = vrot.slane %v308_v42, 1 }
  0x45   : > { %v332_v49 = vsel %vm268_vm0, %v330_v45, 0.0  ;;  %v339_v50 = vsel %vm268_vm0, %v331_v46, 0.0 }
  0x46   : > { %v303_v51 = vadd.f32 %v302_v47, %v301_v41  ;;  %v310_v52 = vadd.f32 %v309_v48, %v308_v42  ;;  %v333_v53 = vrot.slane %v332_v49, 4  ;;  %v340_v54 = vrot.slane %v339_v50, 4 }
  0x48   : > { %568 = vrcp.f32 %v303_v51  ;;  %v334_v55 = vadd.f32 %v333_v53, %v332_v49  ;;  %v341_v56 = vadd.f32 %v340_v54, %v339_v50 }
  0x49   : > { %570 = vrcp.f32 %v310_v52 }
  0x4a   : > { %572 = vlog2.f32 %v303_v51  ;;  %v335_v57 = vrot.slane %v334_v55, 2  ;;  %v342_v58 = vrot.slane %v341_v56, 2 }
  0x4b   : > { %574 = vlog2.f32 %v310_v52 }
  0x4c   : > { %v336_v59 = vadd.f32 %v335_v57, %v334_v55  ;;  %v343_v60 = vadd.f32 %v342_v58, %v341_v56 }
  0x4e   : > { %v569_v62 = vpop.eup %568  ;;  %v337_v63 = vrot.slane %v336_v59, 1  ;;  %v344_v0 = vrot.slane %v343_v60, 1 }
  0x4f   : > { %v571_v1 = vpop.eup %570 }
  0x50   : > { %v573_v2 = vpop.eup %572  ;;  %v315_v3 = vrot.slane %v571_v1, 4  ;;  %v338_v9 = vadd.f32 %v337_v63, %v336_v59  ;;  %v345_v10 = vadd.f32 %v344_v0, %v343_v60 }
  0x51   : > { %v575_v4 = vpop.eup %574  ;;  %v320_v6 = vmul.f32 0.6931472, %v573_v2 }
  0x52   : > { %v316_v7 = vsel %vm268_vm0, %v569_v62, %v315_v3  ;;  %v322_v8 = vmul.f32 0.6931472, %v575_v4 }
  0x53   : > { %v318_v11 = vmul.f32 %v657_v22, %v316_v7  ;;  %v323_v12 = vadd.f32 %v320_v6, %v649_v15 }
  0x54   : > { %v324_v13 = vadd.f32 %v322_v8, %v651_v16 }
  0x55   : > { %v357_v14 = vmul.f32 %v355_v5, %v318_v11  ;;  %v346_v17 = vsub.f32 %v323_v12, %v338_v9 }
  0x56   : > { %v347_v18 = vsub.f32 %v324_v13, %v345_v10 }
  0x57   : > { %378 = vst [vmem:[#allocation1] ss:$2 sm:$0xff] %v357_v14 }
  0x58   : > { %v363_v20 = vrot.slane %v347_v18, 7 }
  0x5a   : > { %v365_v21 = vsel %vm364_vm4, %v346_v17, %v363_v20 }
  0x5b   : > { %v367_v24 = vadd.f32 %v365_v21, %v360_v19 }
  0x5d   : > { %372 = vst.msk [vmem:[#allocation4] sm:$0x3] %vm659_vm1, %v367_v24 }
  0x5e   : > { %v379_v25 = vld.sshfl [vmem:[#allocation1] sm:$0xff pattern:$0x75316420]  ;;  %v380_v26 = vld.sshfl [vmem:[#allocation1 + $0x8] sm:$0xff pattern:$0x75316420] }
  0x5f   : > { %v383_v22 = vsel %vm268_vm0, %v379_v25, 0.0  ;;  %v384_v15 = vsel %vm268_vm0, %v380_v26, 0.0  ;;  %392 = vst [vmem:[#allocation1] ss:$2 sm:$0xff] %v318_v11 }
  0x60   : > { %v385_v16 = vadd.f32 %v384_v15, %v383_v22 }
  0x62   : > { %386 = vadd.xlane.f32.xlu0 %v385_v16 }
  0x64   : > { %v404_v27 = vld [vmem:[#allocation4] sm:$0x3] }
  0x65   : > { %v406_v28 = vperm.slane %v404_v27, 0  ;;  %v407_v29 = vperm.slane %v404_v27, 1 }
  0x66   : > { %v393_v30 = vld.sshfl [vmem:[#allocation1] sm:$0xff pattern:$0x75316420]  ;;  %v394_v31 = vld.sshfl [vmem:[#allocation1 + $0x8] sm:$0xff pattern:$0x75316420] }
  0x67   : > { %v410_v32 = vsel %vm364_vm4, %v406_v28, 0.0  ;;  %v411_v23 = vsel %vm364_vm4, %v407_v29, 0.0  ;;  %v397_v33 = vsel %vm268_vm0, %v393_v30, 0.0  ;;  %v398_v34 = vsel %vm268_vm0, %v394_v31, 0.0 }
  0x68   : > { %v412_v35 = vadd.f32 %v411_v23, %v410_v32  ;;  %v399_v36 = vadd.f32 %v398_v34, %v397_v33 }
  0x6a   : > { %413 = vadd.xlane.f32.xlu1 %v412_v35  ;;  %400 = vadd.xlane.f32.xlu0 %v399_v36 }
  0xd5   : > { %v387_v37 = vpop.xlane.xlu0 %386 }
  0xd6   : > { %389 = vst.msk [vmem:[%s240_s26] sm:$0xf] %vm388_vm5, %v387_v37 }
  0xdd   : > { %v414_v38 = vpop.xlane.xlu1 %413  ;;  %v401_v39 = vpop.xlane.xlu0 %400 }
  0xde   : > { %416 = vst.msk [vmem:[%s235_s29] sm:$0x1] %vm415_vm6, %v414_v38 }
  0xdf   : > { %536 = vst.msk [vmem:[%s240_s26 + $0x4] sm:$0xf] %vm388_vm5, %v401_v39 }
  0xe0 PF: > { %s14_s14 = sadd.s32 1, %s598_s14   ;;  %s711_s12 = smov %s594_s13 }
  0xe1   : > { %p11_p5 = scmp.ge.s32.totalorder %s14_s14, 4   ;;  %s712_s13 = smov %s714_s15 }
  0xe3   :  { %13 = sbr.rel (!%p11_p5) target bundleno = 2 (0x2), region = 82 }

</bundles_post_ra>
